<compile_context>
chip_gen: v7x
topology: tpu7x:2x2x1
jax: 0.10.0
libtpu: 0.0.40
codegen_flags: <defaults>
</compile_context>

<pallas_src>
import jax
import jax.numpy as jnp
from jax.experimental import pallas as pl
from jax.experimental.pallas import tpu as pltpu


def _round_up(a: int, b: int) -> int:
    return (a + b - 1) // b * b


def _cdiv(a: int, b: int) -> int:
    return (a + b - 1) // b


def mlp_kernel(x_ref, w1_ref, b1_ref, w2_ref, b2_ref, o_ref):
    # x: (TM, D_in); w1: (D_in, H); b1: (1, H); w2: (H, D_out); b2: (1, D_out)
    x = x_ref[...]

    # linear1 + bias, f32 accumulate; sigmoid in f32 (EUP).
    h = jnp.dot(x, w1_ref[...], preferred_element_type=jnp.float32)
    h = jax.nn.sigmoid(h + b1_ref[...])

    # linear2 + bias, f32 accumulate.
    o = jnp.dot(h.astype(w2_ref.dtype), w2_ref[...],
                preferred_element_type=jnp.float32)
    o_ref[...] = (o + b2_ref[...]).astype(o_ref.dtype)


def net_forward(x, w1, b1, w2, b2, *, use_bf16=False):
    """Pallas equivalent of Net.forward.

    Args:
      x:  (N, D_in) float32
      w1: (H, D_in) float32   (PyTorch nn.Linear weight layout)
      b1: (H,)      float32
      w2: (D_out, H) float32
      b2: (D_out,)  float32
      use_bf16: stream x / weights as bf16 into the MXU (f32 accumulate and
        f32 bias/sigmoid epilogue). Fast path on v6e/v7x.
    Returns:
      (N, D_out) array with x's dtype.
    """
    N, D_in = x.shape
    H = w1.shape[0]
    D_out = w2.shape[0]

    compute_dtype = jnp.bfloat16 if use_bf16 else jnp.float32
    wsz = jnp.dtype(compute_dtype).itemsize

    # Sublane alignment for the streamed x tile: 8 for f32, 16 for bf16.
    row_align = 16 if use_bf16 else 8
    N_pad = _round_up(max(N, 1), row_align)

    # ---- Row-tile (TM) selection against an explicit VMEM budget -----------
    def vmem_needed(tm):
        resident = (D_in * H + H * D_out) * wsz + (H + D_out) * 4
        streamed = 2 * tm * (D_in * wsz + D_out * 4)   # double-buffered x/out
        interm = tm * (H + D_out) * 4                  # f32 h / o temporaries
        return resident + streamed + interm

    VMEM_BUDGET = 40 << 20        # conservative: fits v7x's 64 MiB with headroom
    TM = _round_up(min(2048, N_pad), row_align)
    while TM > row_align and vmem_needed(TM) > VMEM_BUDGET:
        TM = max(row_align, _round_up(TM // 2, row_align))

    # Keep >= 2 grid steps when there is enough data so the "parallel" axis
    # can actually shard across both TensorCores on v7x.
    if N_pad > row_align and _cdiv(N_pad, TM) < 2:
        TM = _round_up(_cdiv(N_pad, 2), row_align)

    grid = _cdiv(N_pad, TM)       # last tile may be partial (masked by Pallas)

    # ---- One-time wrapper-side prep (hoisted out of the grid loop) ---------
    w1t = w1.astype(compute_dtype).T            # (D_in, H)
    w2t = w2.astype(compute_dtype).T            # (H, D_out)
    b1r = b1.astype(jnp.float32).reshape(1, H)
    b2r = b2.astype(jnp.float32).reshape(1, D_out)

    # x keeps its native D_in width; only pad a handful of rows for alignment.
    x_c = x.astype(compute_dtype)
    if N_pad != N:
        x_c = jnp.pad(x_c, ((0, N_pad - N), (0, 0)))

    vmem_limit = int(min(48 << 20, max(16 << 20, 2 * vmem_needed(TM))))

    out = pl.pallas_call(
        mlp_kernel,
        out_shape=jax.ShapeDtypeStruct((N_pad, D_out), jnp.float32),
        grid_spec=pl.GridSpec(
            grid=(grid,),
            in_specs=[
                pl.BlockSpec((TM, D_in), lambda i: (i, 0)),    # x tile streams
                pl.BlockSpec((D_in, H), lambda i: (0, 0)),     # w1^T resident
                pl.BlockSpec((1, H), lambda i: (0, 0)),        # b1 resident
                pl.BlockSpec((H, D_out), lambda i: (0, 0)),    # w2^T resident
                pl.BlockSpec((1, D_out), lambda i: (0, 0)),    # b2 resident
            ],
            out_specs=pl.BlockSpec((TM, D_out), lambda i: (i, 0)),
        ),
        compiler_params=pltpu.CompilerParams(
            dimension_semantics=("parallel",),
            vmem_limit_bytes=vmem_limit,
        ),
    )(x_c, w1t, b1r, w2t, b2r)

    if N_pad != N:
        out = out[:N]
    return out.astype(x.dtype)


if __name__ == "__main__":
    # Shapes consistent with the module: Net(D_in=32, H=64, D_out=8).
    D_in, H, D_out = 32, 64, 8

    key = jax.random.PRNGKey(0)
    kx, kw1, kb1, kw2, kb2, kx2, kx3 = jax.random.split(key, 7)

    # Deterministic synthetic parameters (PyTorch nn.Linear weight layout).
    w1 = jax.random.normal(kw1, (H, D_in), dtype=jnp.float32) * 0.1
    b1 = jax.random.normal(kb1, (H,), dtype=jnp.float32) * 0.1
    w2 = jax.random.normal(kw2, (D_out, H), dtype=jnp.float32) * 0.1
    b2 = jax.random.normal(kb2, (D_out,), dtype=jnp.float32) * 0.1

    def ref_fn(xv):
        return jax.nn.sigmoid(xv @ w1.T + b1) @ w2.T + b2

    # 1) Small batch (single grid step, row padding 4 -> 8).
    x = jax.random.normal(kx, (4, D_in), dtype=jnp.float32)
    out = net_forward(x, w1, b1, w2, b2)
    jax.block_until_ready(out)
    assert out.shape == (4, D_out)
    assert jnp.allclose(out, ref_fn(x), atol=1e-5, rtol=1e-5)

    # 2) Non-aligned batch: exercises row padding + the 2-step grid split.
    x2 = jax.random.normal(kx2, (300, D_in), dtype=jnp.float32)
    out2 = net_forward(x2, w1, b1, w2, b2)
    jax.block_until_ready(out2)
    assert out2.shape == (300, D_out)
    assert jnp.allclose(out2, ref_fn(x2), atol=1e-5, rtol=1e-5)

    # 3) Batch whose last grid step is a partial (masked) tile.
    x3 = jax.random.normal(kx3, (1000, D_in), dtype=jnp.float32)
    out3 = net_forward(x3, w1, b1, w2, b2)
    jax.block_until_ready(out3)
    assert out3.shape == (1000, D_out)
    assert jnp.allclose(out3, ref_fn(x3), atol=1e-5, rtol=1e-5)

    # 4) bf16 MXU streaming path (v6e/v7x fast path); looser tolerance.
    out_bf16 = net_forward(x3, w1, b1, w2, b2, use_bf16=True)
    jax.block_until_ready(out_bf16)
    assert out_bf16.shape == (1000, D_out)
    assert jnp.allclose(out_bf16, ref_fn(x3), atol=1e-1, rtol=1e-1)

    print("KERNEL_OK")
</pallas_src>

<mosaic_0001>
module attributes {stable_mosaic.version = 11 : i64} {
  func.func @mlp_kernel(%arg0: i32, %arg1: memref<8x32xf32, #tpu.memory_space<vmem>>, %arg2: memref<32x64xf32, #tpu.memory_space<vmem>>, %arg3: memref<1x64xf32, #tpu.memory_space<vmem>>, %arg4: memref<64x8xf32, #tpu.memory_space<vmem>>, %arg5: memref<1x8xf32, #tpu.memory_space<vmem>>, %arg6: memref<8x8xf32, #tpu.memory_space<vmem>>) attributes {dimension_semantics = [#tpu.dimension_semantics<parallel>], iteration_bounds = array<i64: 1>, scalar_prefetch = 0 : i64, scratch_operands = 0 : i64, tpu.core_type = #tpu.core_type<tc>, window_params = [{transform_indices = @transform_0, window_bounds = array<i64: 8, 32>}, {pipeline_mode = #tpu.pipeline_mode<synchronous>, transform_indices = @transform_1, window_bounds = array<i64: 32, 64>}, {pipeline_mode = #tpu.pipeline_mode<synchronous>, transform_indices = @transform_2, window_bounds = array<i64: 1, 64>}, {pipeline_mode = #tpu.pipeline_mode<synchronous>, transform_indices = @transform_3, window_bounds = array<i64: 64, 8>}, {pipeline_mode = #tpu.pipeline_mode<synchronous>, transform_indices = @transform_4, window_bounds = array<i64: 1, 8>}, {transform_indices = @transform_5, window_bounds = array<i64: 8, 8>}]} {
    %c0 = arith.constant 0 : index
    %c0_0 = arith.constant 0 : index
    %0 = vector.load %arg1[%c0, %c0_0] : memref<8x32xf32, #tpu.memory_space<vmem>>, vector<8x32xf32>
    %c0_1 = arith.constant 0 : index
    %c0_2 = arith.constant 0 : index
    %1 = vector.load %arg2[%c0_1, %c0_2] : memref<32x64xf32, #tpu.memory_space<vmem>>, vector<32x64xf32>
    %cst = arith.constant dense<0.000000e+00> : vector<8x64xf32>
    %2 = tpu.matmul %0, %1, %cst {dimension_numbers = #tpu.dot_dimension_numbers<[1], [0], [0], [1], [0, 0, 1, 1], [], []>} : vector<8x32xf32>, vector<32x64xf32>, vector<8x64xf32> -> vector<8x64xf32>
    %c0_3 = arith.constant 0 : index
    %c0_4 = arith.constant 0 : index
    %3 = vector.load %arg3[%c0_3, %c0_4] : memref<1x64xf32, #tpu.memory_space<vmem>>, vector<1x64xf32>
    %4 = vector.broadcast %3 : vector<1x64xf32> to vector<8x64xf32>
    %5 = arith.addf %2, %4 : vector<8x64xf32>
    %6 = arith.negf %5 : vector<8x64xf32>
    %7 = math.exp %6 : vector<8x64xf32>
    %cst_5 = arith.constant 1.000000e+00 : f32
    %8 = vector.broadcast %cst_5 : f32 to vector<8x64xf32>
    %9 = arith.addf %8, %7 : vector<8x64xf32>
    %10 = arith.divf %8, %9 : vector<8x64xf32>
    %c0_6 = arith.constant 0 : index
    %c0_7 = arith.constant 0 : index
    %11 = vector.load %arg4[%c0_6, %c0_7] : memref<64x8xf32, #tpu.memory_space<vmem>>, vector<64x8xf32>
    %cst_8 = arith.constant dense<0.000000e+00> : vector<8x8xf32>
    %12 = tpu.matmul %10, %11, %cst_8 {dimension_numbers = #tpu.dot_dimension_numbers<[1], [0], [0], [1], [0, 0, 1, 1], [], []>} : vector<8x64xf32>, vector<64x8xf32>, vector<8x8xf32> -> vector<8x8xf32>
    %c0_9 = arith.constant 0 : index
    %c0_10 = arith.constant 0 : index
    %13 = vector.load %arg5[%c0_9, %c0_10] : memref<1x8xf32, #tpu.memory_space<vmem>>, vector<1x8xf32>
    %14 = vector.broadcast %13 : vector<1x8xf32> to vector<8x8xf32>
    %15 = arith.addf %12, %14 : vector<8x8xf32>
    %c0_11 = arith.constant 0 : index
    %c0_12 = arith.constant 0 : index
    %16 = vector.load %arg6[%c0_11, %c0_12] : memref<8x8xf32, #tpu.memory_space<vmem>>, vector<8x8xf32>
    tpu.vector_store %arg6[%c0_11, %c0_12], %15 {strides = array<i32>} : memref<8x8xf32, #tpu.memory_space<vmem>>, vector<8x8xf32>,
    return
  }
  func.func @transform_0(%arg0: i32) -> (i32, i32) {
    %c0_i32 = arith.constant 0 : i32
    %c0_i32_0 = arith.constant 0 : i32
    return %arg0, %c0_i32 : i32, i32
  }
  func.func @transform_1(%arg0: i32) -> (i32, i32) {
    %c0_i32 = arith.constant 0 : i32
    %c0_i32_0 = arith.constant 0 : i32
    %c0_i32_1 = arith.constant 0 : i32
    return %c0_i32, %c0_i32_0 : i32, i32
  }
  func.func @transform_2(%arg0: i32) -> (i32, i32) {
    %c0_i32 = arith.constant 0 : i32
    %c0_i32_0 = arith.constant 0 : i32
    %c0_i32_1 = arith.constant 0 : i32
    return %c0_i32, %c0_i32_0 : i32, i32
  }
  func.func @transform_3(%arg0: i32) -> (i32, i32) {
    %c0_i32 = arith.constant 0 : i32
    %c0_i32_0 = arith.constant 0 : i32
    %c0_i32_1 = arith.constant 0 : i32
    return %c0_i32, %c0_i32_0 : i32, i32
  }
  func.func @transform_4(%arg0: i32) -> (i32, i32) {
    %c0_i32 = arith.constant 0 : i32
    %c0_i32_0 = arith.constant 0 : i32
    %c0_i32_1 = arith.constant 0 : i32
    return %c0_i32, %c0_i32_0 : i32, i32
  }
  func.func @transform_5(%arg0: i32) -> (i32, i32) {
    %c0_i32 = arith.constant 0 : i32
    %c0_i32_0 = arith.constant 0 : i32
    return %arg0, %c0_i32 : i32, i32
  }
}

</mosaic_0001>

<bundles_post_ra>
// kernel: tpu_custom_call.1
= control target key start
LH: loop header
LB: loop body
LE: loop exit
PB: predicated region body
PF: predicated region fallthrough
CT: control target
= control target key end

     0   :  { %v317_v3 = vmov 0.0|0.0   ;;  %vm318_vm0 = vmmov 0   ;;  %v319_v6 = vmov 0.0   ;;  %s408_s0 = inlined_call_operand.vmem [shape: f32[8,32], index: 0, kind: input, shape index: {}]   ;;  %s409_s1 = inlined_call_operand.vmem [shape: f32[32,64], index: 1, kind: input, shape index: {}]   ;;  %s410_s2 = inlined_call_operand.vmem [shape: f32[1,64], index: 2, kind: input, shape index: {}]   ;;  %s411_s3 = inlined_call_operand.vmem [shape: f32[64,8], index: 3, kind: input, shape index: {}]   ;;  %s412_s4 = inlined_call_operand.vmem [shape: f32[1,8], index: 4, kind: input, shape index: {}]   ;;  %s413_s5 = inlined_call_operand.hbm [shape: f32[8,8], index: 5, kind: output, shape index: {}]  }
   0x1   :  { %v22_v0 = vld [vmem:[%s409_s1] sm:$0xff]  ;;  %v23_v1 = vld [vmem:[%s409_s1 + $0x8] sm:$0xff]  ;;  %v24_v2 = vld [vmem:[%s409_s1 + $0x10] sm:$0xff]  ;;  %267 = vmatprep.subr.bf16.mxu0 %v317_v3  ;;  %245 = vmatprep.mubr.msk.f32.mxu0 %vm318_vm0, %v319_v6 }
   0x2   :  { %v268_v4 = vpack.c.bf16 %v23_v1, %v22_v0  ;;  %v25_v5 = vld [vmem:[%s409_s1 + $0x18] sm:$0xff]  ;;  %273 = vmatprep.subr.bf16.mxu1 %v317_v3  ;;  %264 = vmatprep.mubr.msk.f32.mxu1 %vm318_vm0, %v319_v6 }
   0x3   :  { %10 = vsyncpa [#allocation3], 0  ;;  %v271_v7 = vpack.c.bf16 %v25_v5, %v24_v2  ;;  %v21_v8 = vld [vmem:[%s408_s0] sm:$0xff]  ;;  %vm33_vm1 = vcmask 261120   ;;  %v114_v10 = vld [vmem:[%s411_s3 + $0x8] sm:$0xff]  ;;  %vm128_vm2 = vcmask 523264  }
   0x4   :  { %269 = vmatpush3.bf16.msra.mxu0 %v268_v4  ;;  %v113_v9 = vld [vmem:[%s411_s3] sm:$0xff]  ;;  %v115_v12 = vld [vmem:[%s411_s3 + $0x10] sm:$0xff]  ;;  %v116_v13 = vld [vmem:[%s411_s3 + $0x18] sm:$0xff]  ;;  %s320_s20 = smov [#allocation2]   ;;  %vm202_vm3 = vcmask 64512  }
   0x5   :  { %270 = vmatprep.subr.bf16.mxu0 %v317_v3  ;;  %v274_v11 = vpack.c.bf16 %v114_v10, %v113_v9  ;;  %v277_v14 = vpack.c.bf16 %v116_v13, %v115_v12  ;;  %v117_v15 = vld [vmem:[%s411_s3 + $0x20] sm:$0xff]  ;;  %v118_v16 = vld [vmem:[%s411_s3 + $0x28] sm:$0xff]  ;;  %v119_v18 = vld [vmem:[%s411_s3 + $0x30] sm:$0xff]  ;;  %s210_s21 = sshll.u32 %s320_s20, 4  ;;  %s211_s21 = int_to_ptr.vmem [resolvable:$true] %s210_s21 }
   0x6   :  { %v280_v17 = vpack.c.bf16 %v118_v16, %v117_v15  ;;  %v120_v19 = vld [vmem:[%s411_s3 + $0x38] sm:$0xff]  ;;  %v218_v21 = vld [vmem:[%s410_s2] ss:$0 sm:$0xff]  ;;  %s293_s2 = scalar_lea.vmem %s211_s21, 128  ;;  %p298_p1 = scmp.lt.s32.totalorder %s211_s21, %s211_s21 }
   0x7   :  { %275 = vmatpush3.bf16.msra.mxu1 %v274_v11  ;;  %v283_v20 = vpack.c.bf16 %v120_v19, %v119_v18  ;;  %v221_v29 = vld [vmem:[%s412_s4] ss:$0 sm:$0xff]  ;;  %p294_p0 = scmp.ne.s32.totalorder %s211_s21, %s293_s2  ;;  %p299_p2 = scmp.lt.s32.totalorder %s293_s2, %s293_s2 }
   0x8   :  { %272 = vmatpush3.bf16.msra.mxu0 %v271_v7  ;;  %276 = vmatprep.subr.bf16.mxu1 %v317_v3 }
   0x9   :  { %p300_p3 = por %p299_p2, %p298_p1 }
   0xb   :  { %246 = vmatmul.mubr.msk.f32.vlgmr.msra.gmra.mrb[0].mxu0 %vm33_vm1, %v21_v8  ;;  %278 = vmatpush3.bf16.msra.mxu1 %v277_v14  ;;  %p301_p4 = pnand %p300_p3, %p294_p0 }
   0xc   :  { %279 = vmatprep.subr.bf16.mxu1 %v317_v3 }
   0xf   :  { %281 = vmatpush3.bf16.msra.mxu1 %v280_v17 }
  0x10   :  { %282 = vmatprep.subr.bf16.mxu1 %v317_v3 }
  0x13   :  { %284 = vmatpush3.bf16.msra.mxu1 %v283_v20 }
  0xde   :  { %v103_v22 = vpop.f32.mrb[0].mxu0 }
  0xdf   :  { %v104_v23 = vadd.f32 %v218_v21, %v103_v22  ;;  %v247_v24 = vpop.f32.mrb[1].mxu0 }
  0xe1   :  { %v220_v25 = vmul.f32 -1.442695, %v104_v23 }
  0xe3   :  { %289 = vpow2.f32 %v220_v25 }
  0xed   :  { %v290_v26 = vpop.eup %289 }
  0xee   :  { %v110_v27 = vadd.f32 1.0, %v290_v26 }
  0xf0   :  { %291 = vrcp.f32 %v110_v27 }
  0xfa   :  { %v292_v28 = vpop.eup %291 }
  0xfb   :  { %265 = vmatmul.mubr.msk.f32.vlgmr.msra.gmra.mrb[0].mxu1 %vm128_vm2, %v292_v28 }
 0x1ce   :  { %v198_v30 = vpop.f32.mrb[0].mxu1 }
 0x1cf   :  { %v199_v31 = vadd.f32 %v221_v29, %v198_v30  ;;  %v266_v32 = vpop.f32.mrb[1].mxu1 }
 0x1d1   :  { %203 = vst.msk [vmem:[#allocation2] sm:$0xff] %vm202_vm3, %v199_v31 }
 0x1d2   :  { %304 = shalt.err (!%p301_p4)
}
 0x1d3   :  { %s305_s24 = scalar_lea.hbm %s413_s5, 128 }
 0x1d4   :  { %p306_p5 = scmp.ne.s32.totalorder %s413_s5, %s305_s24  ;;  %p309_p6 = scmp.lt.u32.totalorder %s305_s24, %s413_s5 }
 0x1d6   :  { %p311_p7 = pnand %p309_p6, %p306_p5 }
 0x1d8   :  { %314 = shalt.err (!%p311_p7)
}
 0x1d9   :  { %213 = dma.vmem_to_hbm [thread:$0]  %s211_s21, 128, %s413_s5, [#allocation3]  }
 0x1da   :  { %315 = dma.done.wait [#allocation3], 128  }
 0x1db   :  { %316 = vsyncadd [#allocation3], 4294967168 }
 0x1dc   :  { %217 = vsyncpa [#allocation3], 1 }

</bundles_post_ra>
